<compile_context>
chip_gen: v6e
topology: v6e:2x2x1
jax: 0.10.0
libtpu: 0.0.40
codegen_flags: <defaults>
</compile_context>

<pallas_src>
import math

import jax
import jax.numpy as jnp
from jax.experimental import pallas as pl
from jax.experimental.pallas import tpu as pltpu


def _round_up(v, m):
    return (v + m - 1) // m * m


def _padded_dims(D, F, tile_k):
    """Guard tile_k (multiple of 128, <= D_pad) and compute padded dims."""
    tile_k = max(128, min(_round_up(tile_k, 128), _round_up(D, 128)))
    D_pad = _round_up(D, tile_k)
    F_pad = _round_up(F, 128)
    return tile_k, D_pad, F_pad


def prepare_projection_weight(w, *, tile_k=2048):
    """One-time pad + bf16 cast of the Linear weight.

    Call this OUTSIDE the training/inference hot path; passing the result to
    projection_discriminator avoids an extra HBM read+write of W per call.
    """
    D, F = w.shape
    _, D_pad, F_pad = _padded_dims(D, F, tile_k)
    return jnp.pad(w, ((0, D_pad - D), (0, F_pad - F))).astype(jnp.bfloat16)


def projection_disc_kernel(x_ref, w_ref, emb_ref, out_ref, acc_ref):
    """One (K-tile, B-tile) grid step.  Grid = (nk, nb), K is the OUTER axis.

    x_ref   : (TB, TK)     bf16  activation tile (streamed once total)
    w_ref   : (TK, Fp)     bf16  weight tile (streamed once total: block index
                                 depends only on k, so it stays resident
                                 across the inner B loop)
    emb_ref : (B_pad, Fp)  f32   gathered class embeddings (VMEM-resident)
    out_ref : (B_pad, 1)   f32   projection scores (resident, written at end)
    acc_ref : (B_pad, 1)   f32   score accumulator (VMEM scratch)
    """
    k = pl.program_id(0)
    b = pl.program_id(1)
    nk = pl.num_programs(0)
    nb = pl.num_programs(1)
    tb = x_ref.shape[0]

    @pl.when((k == 0) & (b == 0))
    def _init():
        acc_ref[...] = jnp.zeros_like(acc_ref)

    # Partial features for this (B-tile, K-tile) on the MXU, f32 accumulation.
    feat_k = jnp.dot(x_ref[...], w_ref[...], preferred_element_type=jnp.float32)

    # Per-sample projection contribution: sum_f emb * feat_k  ->  (TB, 1).
    row0 = pl.multiple_of(b * tb, tb)
    emb_tile = emb_ref[pl.ds(row0, tb), :]
    acc_ref[pl.ds(row0, tb), :] += jnp.sum(emb_tile * feat_k, axis=-1,
                                           keepdims=True)

    @pl.when((k == nk - 1) & (b == nb - 1))
    def _finalize():
        out_ref[...] = acc_ref[...]


def projection_discriminator(x, y, w, b, embed_table, *, tile_b=256,
                             tile_k=2048):
    """Fused forward: sum(embed(y) * (flatten(x) @ W + b), axis=1) -> (B,) f32.

    `w` may be the raw f32 (D, F) weight or the bf16 (D_pad, F_pad) output of
    prepare_projection_weight (preferred: keeps the pad+cast off the hot path).
    """
    B = x.shape[0]
    D = math.prod(x.shape[1:])
    F = embed_table.shape[1]

    tile_k, D_pad, F_pad = _padded_dims(D, F, tile_k)
    if B <= tile_b:
        tile_b = _round_up(B, 8)        # single B tile == full padded batch
    else:
        tile_b = _round_up(tile_b, 16)  # partial blocks: align to bf16 packing
    B_pad = _round_up(B, tile_b)
    nb = B_pad // tile_b
    nk = D_pad // tile_k

    # ---- glue (plain JAX): flatten NCHW, gather embeddings, fold the bias ----
    x_flat = jnp.pad(x.reshape(B, D),
                     ((0, B_pad - B), (0, D_pad - D))).astype(jnp.bfloat16)

    if w.shape == (D_pad, F_pad) and w.dtype == jnp.bfloat16:
        w_p = w                                              # already prepared
    else:
        w_p = prepare_projection_weight(w, tile_k=tile_k)    # per-call fallback

    emb = embed_table[y].astype(jnp.float32)                 # (B, F) gather
    bias_term = emb @ b.astype(jnp.float32)                  # (B,) tiny dot
    emb_p = jnp.pad(emb, ((0, B_pad - B), (0, F_pad - F)))   # padded rows -> 0

    cost = pl.CostEstimate(
        flops=2 * B_pad * D_pad * F_pad,
        transcendentals=0,
        bytes_accessed=(x_flat.size * 2 + w_p.size * 2 + emb_p.size * 4
                        + B_pad * 4),
    )

    # TODO(synk): on v7x with nb == 1 (small batch) one of the two TensorCores
    # idles; splitting the K reduction across a core-parallel axis (partial
    # scores summed in the glue) would roughly double throughput there.
    scores = pl.pallas_call(
        projection_disc_kernel,
        out_shape=jax.ShapeDtypeStruct((B_pad, 1), jnp.float32),
        grid_spec=pltpu.PrefetchScalarGridSpec(
            num_scalar_prefetch=0,
            grid=(nk, nb),                 # K outer -> W streamed exactly once
            in_specs=[
                pl.BlockSpec((tile_b, tile_k), lambda k, b: (b, k)),   # x
                pl.BlockSpec((tile_k, F_pad), lambda k, b: (k, 0)),    # W
                pl.BlockSpec((B_pad, F_pad), lambda k, b: (0, 0)),     # emb
            ],
            out_specs=pl.BlockSpec((B_pad, 1), lambda k, b: (0, 0)),
            scratch_shapes=[pltpu.VMEM((B_pad, 1), jnp.float32)],
        ),
        compiler_params=pltpu.CompilerParams(
            dimension_semantics=("arbitrary", "arbitrary"),
        ),
        cost_estimate=cost,
    )(x_flat, w_p, emb_p)

    return scores[:B, 0] + bias_term


if __name__ == "__main__":
    # Small, deterministic shapes consistent with the module.
    B, C, H, W = 2, 4, 16, 16
    D = C * H * W            # 1024
    n_features = 128
    n_classes = 10

    key = jax.random.PRNGKey(0)
    kx, kw, kb, ke, ky = jax.random.split(key, 5)

    x = jax.random.normal(kx, (B, C, H, W), dtype=jnp.float32)
    y = jax.random.randint(ky, (B,), 0, n_classes, dtype=jnp.int32)

    # Deterministic synthetic parameters (adv_feature_model == flatten+Linear).
    # TODO(synk): the original module wraps an arbitrary adv_feature_model;
    # only a flatten + single-Linear feature extractor is fused here.
    w_lin = jax.random.normal(kw, (D, n_features), dtype=jnp.float32) * 0.02
    b_lin = jax.random.normal(kb, (n_features,), dtype=jnp.float32) * 0.02
    embed_table = jax.random.normal(ke, (n_classes, n_features),
                                    dtype=jnp.float32)

    def ref_bf16(xv, yv):
        feat = jnp.dot(xv.reshape(xv.shape[0], D).astype(jnp.bfloat16),
                       w_lin.astype(jnp.bfloat16),
                       preferred_element_type=jnp.float32) + b_lin
        return jnp.sum(embed_table[yv] * feat, axis=1)

    def ref_f32(xv, yv):
        feat = xv.reshape(xv.shape[0], D) @ w_lin + b_lin
        return jnp.sum(embed_table[yv] * feat, axis=1)

    # --- 1) common path: weight prepared once outside the hot path ----------
    w_prepped = prepare_projection_weight(w_lin)
    out = projection_discriminator(x, y, w_prepped, b_lin, embed_table)
    out = jax.block_until_ready(out)
    assert out.shape == (B,)
    assert jnp.allclose(out, ref_bf16(x, y), atol=2e-3, rtol=2e-3), (
        out, ref_bf16(x, y))
    assert jnp.allclose(out, ref_f32(x, y), atol=0.5, rtol=5e-2), (
        out, ref_f32(x, y))

    # --- 2) multi-tile path: nk > 1 and nb > 1 (exercises the accumulator) --
    B2 = 24
    kx2, ky2 = jax.random.split(jax.random.PRNGKey(1), 2)
    x2 = jax.random.normal(kx2, (B2, C, H, W), dtype=jnp.float32)
    y2 = jax.random.randint(ky2, (B2,), 0, n_classes, dtype=jnp.int32)
    w_prepped2 = prepare_projection_weight(w_lin, tile_k=256)
    out2 = projection_discriminator(x2, y2, w_prepped2, b_lin, embed_table,
                                    tile_b=16, tile_k=256)
    out2 = jax.block_until_ready(out2)
    assert out2.shape == (B2,)
    assert jnp.allclose(out2, ref_bf16(x2, y2), atol=2e-3, rtol=2e-3), (
        out2, ref_bf16(x2, y2))
    assert jnp.allclose(out2, ref_f32(x2, y2), atol=0.5, rtol=5e-2), (
        out2, ref_f32(x2, y2))

    print("KERNEL_OK")
</pallas_src>

<mosaic_0001>
module attributes {stable_mosaic.version = 11 : i64} {
  func.func @projection_disc_kernel(%arg0: i32, %arg1: i32, %arg2: memref<8x1024xbf16, #tpu.memory_space<vmem>>, %arg3: memref<1024x128xbf16, #tpu.memory_space<vmem>>, %arg4: memref<8x128xf32, #tpu.memory_space<vmem>>, %arg5: memref<8x1xf32, #tpu.memory_space<vmem>>, %arg6: memref<8x1xf32, #tpu.memory_space<vmem>>) attributes {dimension_semantics = [#tpu.dimension_semantics<arbitrary>, #tpu.dimension_semantics<arbitrary>], iteration_bounds = array<i64: 1, 1>, scalar_prefetch = 0 : i64, scratch_operands = 1 : i64, tpu.core_type = #tpu.core_type<tc>, window_params = [{transform_indices = @transform_0, window_bounds = array<i64: 8, 1024>}, {transform_indices = @transform_1, window_bounds = array<i64: 1024, 128>}, {pipeline_mode = #tpu.pipeline_mode<synchronous>, transform_indices = @transform_2, window_bounds = array<i64: 8, 128>}, {pipeline_mode = #tpu.pipeline_mode<synchronous>, transform_indices = @transform_3, window_bounds = array<i64: 8, 1>}]} {
    %c0_i32 = arith.constant 0 : i32
    %0 = arith.cmpi eq, %arg0, %c0_i32 : i32
    %c0_i32_0 = arith.constant 0 : i32
    %1 = arith.cmpi eq, %arg1, %c0_i32_0 : i32
    %2 = arith.andi %0, %1 : i1
    %3 = arith.extui %2 : i1 to i32
    %c0_i32_1 = arith.constant 0 : i32
    %4 = arith.cmpi ne, %3, %c0_i32_1 : i32
    scf.if %4 {
      %cst_12 = arith.constant 0.000000e+00 : f32
      %25 = vector.broadcast %cst_12 : f32 to vector<8x1xf32>
      %c0_13 = arith.constant 0 : index
      %c0_14 = arith.constant 0 : index
      %26 = vector.load %arg6[%c0_13, %c0_14] : memref<8x1xf32, #tpu.memory_space<vmem>>, vector<8x1xf32>
      tpu.vector_store %arg6[%c0_13, %c0_14], %25 {strides = array<i32>} : memref<8x1xf32, #tpu.memory_space<vmem>>, vector<8x1xf32>,
    } else {
    }
    %c0 = arith.constant 0 : index
    %c0_2 = arith.constant 0 : index
    %5 = vector.load %arg2[%c0, %c0_2] : memref<8x1024xbf16, #tpu.memory_space<vmem>>, vector<8x1024xbf16>
    %c0_3 = arith.constant 0 : index
    %c0_4 = arith.constant 0 : index
    %6 = vector.load %arg3[%c0_3, %c0_4] : memref<1024x128xbf16, #tpu.memory_space<vmem>>, vector<1024x128xbf16>
    %cst = arith.constant dense<0.000000e+00> : vector<8x128xf32>
    %7 = tpu.matmul %5, %6, %cst {dimension_numbers = #tpu.dot_dimension_numbers<[1], [0], [0], [1], [0, 0, 1, 1], [], []>} : vector<8x1024xbf16>, vector<1024x128xbf16>, vector<8x128xf32> -> vector<8x128xf32>
    %c8_i32 = arith.constant 8 : i32
    %8 = arith.muli %arg1, %c8_i32 : i32
    %9 = tpu.assume_multiple %8, 8 : i32
    %10 = arith.index_cast %9 : i32 to index
    %c0_5 = arith.constant 0 : index
    %11 = vector.load %arg4[%10, %c0_5] : memref<8x128xf32, #tpu.memory_space<vmem>>, vector<8x128xf32>
    %12 = arith.index_cast %9 : i32 to index
    %c0_6 = arith.constant 0 : index
    %13 = vector.load %arg6[%12, %c0_6] : memref<8x1xf32, #tpu.memory_space<vmem>>, vector<8x1xf32>
    %14 = arith.mulf %11, %7 : vector<8x128xf32>
    %cst_7 = arith.constant dense<0.000000e+00> : vector<8xf32>
    %15 = vector.multi_reduction <add>, %14, %cst_7 [1] : vector<8x128xf32> to vector<8xf32>
    %16 = vector.shape_cast %15 : vector<8xf32> to vector<8x1xf32>
    %17 = arith.addf %13, %16 : vector<8x1xf32>
    %18 = arith.index_cast %9 : i32 to index
    %c0_8 = arith.constant 0 : index
    %19 = vector.load %arg6[%18, %c0_8] : memref<8x1xf32, #tpu.memory_space<vmem>>, vector<8x1xf32>
    tpu.vector_store %arg6[%18, %c0_8], %17 {strides = array<i32>} : memref<8x1xf32, #tpu.memory_space<vmem>>, vector<8x1xf32>,
    %c0_i32_9 = arith.constant 0 : i32
    %20 = arith.cmpi eq, %arg0, %c0_i32_9 : i32
    %c0_i32_10 = arith.constant 0 : i32
    %21 = arith.cmpi eq, %arg1, %c0_i32_10 : i32
    %22 = arith.andi %20, %21 : i1
    %23 = arith.extui %22 : i1 to i32
    %c0_i32_11 = arith.constant 0 : i32
    %24 = arith.cmpi ne, %23, %c0_i32_11 : i32
    scf.if %24 {
      %c0_12 = arith.constant 0 : index
      %c0_13 = arith.constant 0 : index
      %25 = vector.load %arg6[%c0_12, %c0_13] : memref<8x1xf32, #tpu.memory_space<vmem>>, vector<8x1xf32>
      %c0_14 = arith.constant 0 : index
      %c0_15 = arith.constant 0 : index
      %26 = vector.load %arg5[%c0_14, %c0_15] : memref<8x1xf32, #tpu.memory_space<vmem>>, vector<8x1xf32>
      tpu.vector_store %arg5[%c0_14, %c0_15], %25 {strides = array<i32>} : memref<8x1xf32, #tpu.memory_space<vmem>>, vector<8x1xf32>,
    } else {
    }
    return
  }
  func.func @transform_0(%arg0: i32, %arg1: i32) -> (i32, i32) {
    %c0_i32 = arith.constant 0 : i32
    return %arg1, %arg0 : i32, i32
  }
  func.func @transform_1(%arg0: i32, %arg1: i32) -> (i32, i32) {
    %c0_i32 = arith.constant 0 : i32
    %c0_i32_0 = arith.constant 0 : i32
    return %arg0, %c0_i32 : i32, i32
  }
  func.func @transform_2(%arg0: i32, %arg1: i32) -> (i32, i32) {
    %c0_i32 = arith.constant 0 : i32
    %c0_i32_0 = arith.constant 0 : i32
    %c0_i32_1 = arith.constant 0 : i32
    return %c0_i32, %c0_i32_0 : i32, i32
  }
  func.func @transform_3(%arg0: i32, %arg1: i32) -> (i32, i32) {
    %c0_i32 = arith.constant 0 : i32
    %c0_i32_0 = arith.constant 0 : i32
    %c0_i32_1 = arith.constant 0 : i32
    return %c0_i32, %c0_i32_0 : i32, i32
  }
}

</mosaic_0001>

<bundles_post_ra>
// kernel: tpu_custom_call.1
= control target key start
LH: loop header
LB: loop body
LE: loop exit
PB: predicated region body
PF: predicated region fallthrough
CT: control target
= control target key end

     0   :  { %8 = vsyncpa [#allocation4], 0  ;;  %s1128_s0 = inlined_call_operand.hbm [shape: bf16[8,1024], index: 0, kind: input, shape index: {}]   ;;  %s1129_s1 = inlined_call_operand.hbm [shape: bf16[1024,128], index: 1, kind: input, shape index: {}]   ;;  %s1130_s2 = inlined_call_operand.hbm [shape: f32[8,128], index: 2, kind: input, shape index: {}]   ;;  %s1131_s3 = inlined_call_operand.vmem [shape: f32[8,1], index: 3, kind: output, shape index: {}]  }
   0x1   :  { %9 = vsyncpa [#allocation6], 0  ;;  %s1087_s12 = smov [#allocation5]  }
   0x2   :  { %s25_s13 = sshll.u32 %s1087_s12, 4  ;;  %s26_s13 = int_to_ptr.vmem [resolvable:$true] %s25_s13 }
   0x3   :  { %s1031_s14 = scalar_lea.vmem %s26_s13, 8192  ;;  %p1036_p1 = scmp.lt.s32.totalorder %s26_s13, %s26_s13 }
   0x4   :  { %p1032_p0 = scmp.ne.s32.totalorder %s26_s13, %s1031_s14  ;;  %p1037_p2 = scmp.lt.s32.totalorder %s1031_s14, %s1031_s14 }
   0x6   :  { %p1038_p3 = por %p1037_p2, %p1036_p1 }
   0x8   :  { %p1039_p4 = pnand %p1038_p3, %p1032_p0 }
   0xa   :  { %1042 = shalt.err (!%p1039_p4)
}
   0xb   :  { %s1088_s15 = smov 64   ;;  %s1089_s16 = smov 4  }
   0xc   :  { %31 = dma.hbm_to_vmem [thread:$0]  %s1129_s1, 8192, %s26_s13, [#allocation6], %s1088_s15, %s1088_s15, %s1089_s16  }
   0xd   :  { %s1090_s19 = smov [#allocation3]   ;;  %s1091_s21 = smov [#allocation7]  }
   0xe   :  { %s16_s20 = sshll.u32 %s1090_s19, 4  ;;  %s38_s22 = sshll.u32 %s1091_s21, 4  ;;  %s17_s20 = int_to_ptr.vmem [resolvable:$true] %s16_s20  ;;  %s39_s22 = int_to_ptr.vmem [resolvable:$true] %s38_s22 }
   0xf   :  { %s1051_s23 = scalar_lea.vmem %s17_s20, 512  ;;  %p1056_p6 = scmp.lt.s32.totalorder %s17_s20, %s17_s20 }
  0x10   :  { %p1052_p5 = scmp.ne.s32.totalorder %s17_s20, %s1051_s23  ;;  %p1057_p7 = scmp.lt.s32.totalorder %s1051_s23, %s1051_s23 }
  0x12   :  { %p1058_p8 = por %p1057_p7, %p1056_p6 }
  0x14   :  { %p1059_p9 = pnand %p1058_p8, %p1052_p5 }
  0x16   :  { %1062 = shalt.err (!%p1059_p9)
}
  0x17   :  { %19 = dma.hbm_to_vmem [thread:$0]  %s1128_s0, 512, %s17_s20, [#allocation4]  }
  0x18   :  { %s1071_s26 = scalar_lea.vmem %s39_s22, 128  ;;  %p1076_p11 = scmp.lt.s32.totalorder %s39_s22, %s39_s22 }
  0x19   :  { %p1072_p10 = scmp.ne.s32.totalorder %s39_s22, %s1071_s26  ;;  %p1077_p12 = scmp.lt.s32.totalorder %s1071_s26, %s1071_s26 }
  0x1b   :  { %p1078_p13 = por %p1077_p12, %p1076_p11 }
  0x1d   :  { %p1079_p0 = pnand %p1078_p13, %p1072_p10 }
  0x1f   :  { %1082 = shalt.err (!%p1079_p0)
}
  0x20   :  { %41 = dma.hbm_to_vmem [thread:$0]  %s1130_s2, 128, %s39_s22, [#allocation6]  }
  0x21   :  { %1083 = dma.done.wait [#allocation4], 512  }
  0x22   :  { %1084 = vsyncadd [#allocation4], 4294966784 }
  0x23   :  { %1085 = dma.done.wait [#allocation6], 8320  }
  0x24   :  { %1086 = vsyncadd [#allocation6], 4294958976  ;;  %v951_v0 = vld [vmem:[#allocation5 + $0x78] sm:$0xff]   ;;  %v955_v4 = vld [vmem:[#allocation5 + $0x70] sm:$0xff]   ;;  %vm58_vm0 = vcmask 7168  }
  0x25   :  { %v952_v1 = vld [vmem:[#allocation5 + $0xf8] sm:$0xff]   ;;  %857 = vmatprep.subr.bf16.mxu0 %v951_v0  ;;  %v956_v5 = vld [vmem:[#allocation5 + $0xf0] sm:$0xff]   ;;  %v959_v8 = vld [vmem:[#allocation5 + $0x68] sm:$0xff]  }
  0x26   :  { %v953_v2 = vld [vmem:[#allocation5 + $0x38] sm:$0xff]   ;;  %879 = vmatprep.subr.bf16.mxu1 %v952_v1  ;;  %v957_v6 = vld [vmem:[#allocation5 + $0x30] sm:$0xff]   ;;  %v960_v9 = vld [vmem:[#allocation5 + $0xe8] sm:$0xff]  }
  0x27   :  { %v954_v3 = vld [vmem:[#allocation5 + $0xb8] sm:$0xff]   ;;  %858 = vmatpush3.bf16.msra.mxu0 %v953_v2  ;;  %v958_v7 = vld [vmem:[#allocation5 + $0xb0] sm:$0xff]   ;;  %v961_v10 = vld [vmem:[#allocation5 + $0x28] sm:$0xff]  }
  0x28   :  { %880 = vmatpush3.bf16.msra.mxu1 %v954_v3  ;;  %859 = vmatprep.subr.bf16.mxu0 %v955_v4  ;;  %v962_v11 = vld [vmem:[#allocation5 + $0xa8] sm:$0xff]   ;;  %v963_v12 = vld [vmem:[#allocation5 + $0x60] sm:$0xff]   ;;  %v967_v16 = vld [vmem:[#allocation5 + $0x58] sm:$0xff]  }
  0x29   :  { %881 = vmatprep.subr.bf16.mxu1 %v956_v5  ;;  %v964_v13 = vld [vmem:[#allocation5 + $0xe0] sm:$0xff]   ;;  %v968_v17 = vld [vmem:[#allocation5 + $0xd8] sm:$0xff]   ;;  %v971_v20 = vld [vmem:[#allocation5 + $0x50] sm:$0xff]  }
  0x2a   :  { %v965_v14 = vld [vmem:[#allocation5 + $0x20] sm:$0xff]   ;;  %v969_v18 = vld [vmem:[#allocation5 + $0x18] sm:$0xff]   ;;  %v972_v21 = vld [vmem:[#allocation5 + $0xd0] sm:$0xff]  }
  0x2b   :  { %860 = vmatpush3.bf16.msra.mxu0 %v957_v6  ;;  %v966_v15 = vld [vmem:[#allocation5 + $0xa0] sm:$0xff]   ;;  %v970_v19 = vld [vmem:[#allocation5 + $0x98] sm:$0xff]   ;;  %v973_v22 = vld [vmem:[#allocation5 + $0x10] sm:$0xff]  }
  0x2c   :  { %882 = vmatpush3.bf16.msra.mxu1 %v958_v7  ;;  %861 = vmatprep.subr.bf16.mxu0 %v959_v8  ;;  %v974_v23 = vld [vmem:[#allocation5 + $0x90] sm:$0xff]   ;;  %v975_v24 = vld [vmem:[#allocation5 + $0x48] sm:$0xff]   ;;  %v979_v28 = vld [vmem:[#allocation5 + $0x40] sm:$0xff]  }
  0x2d   :  { %883 = vmatprep.subr.bf16.mxu1 %v960_v9  ;;  %v976_v25 = vld [vmem:[#allocation5 + $0xc8] sm:$0xff]   ;;  %v980_v29 = vld [vmem:[#allocation5 + $0xc0] sm:$0xff]   ;;  %v987_v38 = vld [vmem:[#allocation5 + $0x178] sm:$0xff]  }
  0x2e   :  { %v977_v26 = vld [vmem:[#allocation5 + $0x8] sm:$0xff]   ;;  %v981_v30 = vld [vmem:[#allocation5] sm:$0xff]   ;;  %v988_v39 = vld [vmem:[#allocation5 + $0x1f8] sm:$0xff]  }
  0x2f   :  { %862 = vmatpush3.bf16.msra.mxu0 %v961_v10  ;;  %v978_v27 = vld [vmem:[#allocation5 + $0x88] sm:$0xff]   ;;  %v982_v31 = vld [vmem:[#allocation5 + $0x80] sm:$0xff]   ;;  %v989_v40 = vld [vmem:[#allocation5 + $0x138] sm:$0xff]  }
  0x30   :  { %884 = vmatpush3.bf16.msra.mxu1 %v962_v11  ;;  %863 = vmatprep.subr.bf16.mxu0 %v963_v12  ;;  %v60_v32 = vld [vmem:[#allocation3] sm:$0xff]  ;;  %v61_v33 = vld [vmem:[#allocation3 + $0x8] sm:$0xff]  ;;  %v990_v41 = vld [vmem:[#allocation5 + $0x1b8] sm:$0xff]   ;;  %v1092_v12 = vmov 0.0  }
  0x31   :  { %885 = vmatprep.subr.bf16.mxu1 %v964_v13  ;;  %v785_v34 = vcombine.low %v60_v32, %v60_v32  ;;  %v786_v35 = vcombine.high %v60_v32, %v60_v32  ;;  %v787_v36 = vcombine.low %v61_v33, %v61_v33  ;;  %v788_v37 = vcombine.high %v61_v33, %v61_v33  ;;  %v991_v42 = vld [vmem:[#allocation5 + $0x170] sm:$0xff]   ;;  %v995_v46 = vld [vmem:[#allocation5 + $0x168] sm:$0xff]   ;;  %v999_v50 = vld [vmem:[#allocation5 + $0x160] sm:$0xff]  }
  0x32   :  { %v992_v43 = vld [vmem:[#allocation5 + $0x1f0] sm:$0xff]   ;;  %v996_v47 = vld [vmem:[#allocation5 + $0x1e8] sm:$0xff]   ;;  %v1000_v51 = vld [vmem:[#allocation5 + $0x1e0] sm:$0xff]   ;;  %59 = vst.msk [vmem:[#allocation2] sm:$0xff] %vm58_vm0, %v1092_v12 }
  0x33   :  { %864 = vmatpush3.bf16.msra.mxu0 %v965_v14  ;;  %636 = vmatprep.mubr.bf16.mxu0 %v786_v35  ;;  %v993_v44 = vld [vmem:[#allocation5 + $0x130] sm:$0xff]   ;;  %v997_v48 = vld [vmem:[#allocation5 + $0x128] sm:$0xff]   ;;  %v1001_v52 = vld [vmem:[#allocation5 + $0x120] sm:$0xff]  }
  0x34   :  { %886 = vmatpush3.bf16.msra.mxu1 %v966_v15  ;;  %865 = vmatprep.subr.bf16.mxu0 %v967_v16  ;;  %v994_v45 = vld [vmem:[#allocation5 + $0x1b0] sm:$0xff]   ;;  %v998_v49 = vld [vmem:[#allocation5 + $0x1a8] sm:$0xff]   ;;  %v1002_v53 = vld [vmem:[#allocation5 + $0x1a0] sm:$0xff]  }
  0x35   :  { %887 = vmatprep.subr.bf16.mxu1 %v968_v17  ;;  %676 = vmatprep.mubr.bf16.mxu1 %v788_v37  ;;  %v1003_v54 = vld [vmem:[#allocation5 + $0x158] sm:$0xff]   ;;  %v1007_v58 = vld [vmem:[#allocation5 + $0x150] sm:$0xff]   ;;  %v1011_v62 = vld [vmem:[#allocation5 + $0x148] sm:$0xff]  }
  0x36   :  { %v1004_v55 = vld [vmem:[#allocation5 + $0x1d8] sm:$0xff]   ;;  %v1008_v59 = vld [vmem:[#allocation5 + $0x1d0] sm:$0xff]   ;;  %v1012_v63 = vld [vmem:[#allocation5 + $0x1c8] sm:$0xff]  }
  0x37   :  { %866 = vmatpush3.bf16.msra.mxu0 %v969_v18  ;;  %v1005_v56 = vld [vmem:[#allocation5 + $0x118] sm:$0xff]   ;;  %v1009_v60 = vld [vmem:[#allocation5 + $0x110] sm:$0xff]   ;;  %v1013_v0 = vld [vmem:[#allocation5 + $0x108] sm:$0xff]  }
  0x38   :  { %888 = vmatpush3.bf16.msra.mxu1 %v970_v19  ;;  %867 = vmatprep.subr.bf16.mxu0 %v971_v20  ;;  %v1006_v57 = vld [vmem:[#allocation5 + $0x198] sm:$0xff]   ;;  %v1010_v61 = vld [vmem:[#allocation5 + $0x190] sm:$0xff]   ;;  %v1014_v1 = vld [vmem:[#allocation5 + $0x188] sm:$0xff]  }
  0x39   :  { %889 = vmatprep.subr.bf16.mxu1 %v972_v21  ;;  %v1015_v2 = vld [vmem:[#allocation5 + $0x140] sm:$0xff]   ;;  %v62_v6 = vld [vmem:[#allocation3 + $0x10] sm:$0xff]  ;;  %v63_v9 = vld [vmem:[#allocation3 + $0x18] sm:$0xff] }
  0x3a   :  { %v1016_v3 = vld [vmem:[#allocation5 + $0x1c0] sm:$0xff]   ;;  %v789_v7 = vcombine.low %v62_v6, %v62_v6  ;;  %v790_v8 = vcombine.high %v62_v6, %v62_v6  ;;  %v791_v10 = vcombine.low %v63_v9, %v63_v9  ;;  %v792_v11 = vcombine.high %v63_v9, %v63_v9 }
  0x3b   :  { %868 = vmatpush3.bf16.msra.mxu0 %v973_v22  ;;  %v1017_v4 = vld [vmem:[#allocation5 + $0x100] sm:$0xff]  }
  0x3c   :  { %890 = vmatpush3.bf16.msra.mxu1 %v974_v23  ;;  %869 = vmatprep.subr.bf16.mxu0 %v975_v24  ;;  %v1018_v5 = vld [vmem:[#allocation5 + $0x180] sm:$0xff]  }
  0x3d   :  { %891 = vmatprep.subr.bf16.mxu1 %v976_v25  ;;  %v766_v35 = vld [vmem:[#allocation7] sm:$0xff] }
  0x3f   :  { %870 = vmatpush3.bf16.msra.mxu0 %v977_v26 }
  0x40   :  { %892 = vmatpush3.bf16.msra.mxu1 %v978_v27  ;;  %871 = vmatprep.subr.bf16.mxu0 %v979_v28 }
  0x41   :  { %893 = vmatprep.subr.bf16.mxu1 %v980_v29 }
  0x43   :  { %872 = vmatpush3.bf16.msra.mxu0 %v981_v30 }
  0x44   :  { %894 = vmatpush3.bf16.msra.mxu1 %v982_v31  ;;  %901 = vmatprep.subr.bf16.mxu0 %v987_v38  ;;  %v768_v38 = vld [vmem:[#allocation2] sm:$0xff] }
  0x45   :  { %923 = vmatprep.subr.bf16.mxu1 %v988_v39 }
  0x46   :  { %637 = vmatmul.mubr.bf16.vlgmr.msra.gmra.mxu0 %v785_v34 }
  0x47   :  { %677 = vmatmul.mubr.bf16.vlgmr.msra.gmra.mxu1 %v787_v36  ;;  %902 = vmatpush3.bf16.msra.mxu0 %v989_v40 }
  0x48   :  { %924 = vmatpush3.bf16.msra.mxu1 %v990_v41  ;;  %903 = vmatprep.subr.bf16.mxu0 %v991_v42 }
  0x49   :  { %925 = vmatprep.subr.bf16.mxu1 %v992_v43  ;;  %716 = vmatprep.mubr.bf16.mxu0 %v790_v8 }
  0x4a   :  { %756 = vmatprep.mubr.bf16.mxu1 %v792_v11 }
  0x4b   :  { %904 = vmatpush3.bf16.msra.mxu0 %v993_v44 }
  0x4c   :  { %926 = vmatpush3.bf16.msra.mxu1 %v994_v45  ;;  %905 = vmatprep.subr.bf16.mxu0 %v995_v46 }
  0x4d   :  { %927 = vmatprep.subr.bf16.mxu1 %v996_v47 }
  0x4f   :  { %906 = vmatpush3.bf16.msra.mxu0 %v997_v48 }
  0x50   :  { %928 = vmatpush3.bf16.msra.mxu1 %v998_v49  ;;  %907 = vmatprep.subr.bf16.mxu0 %v999_v50 }
  0x51   :  { %929 = vmatprep.subr.bf16.mxu1 %v1000_v51 }
  0x53   :  { %908 = vmatpush3.bf16.msra.mxu0 %v1001_v52 }
  0x54   :  { %930 = vmatpush3.bf16.msra.mxu1 %v1002_v53  ;;  %909 = vmatprep.subr.bf16.mxu0 %v1003_v54 }
  0x55   :  { %931 = vmatprep.subr.bf16.mxu1 %v1004_v55 }
  0x57   :  { %910 = vmatpush3.bf16.msra.mxu0 %v1005_v56 }
  0x58   :  { %932 = vmatpush3.bf16.msra.mxu1 %v1006_v57  ;;  %911 = vmatprep.subr.bf16.mxu0 %v1007_v58 }
  0x59   :  { %933 = vmatprep.subr.bf16.mxu1 %v1008_v59 }
  0x5b   :  { %912 = vmatpush3.bf16.msra.mxu0 %v1009_v60 }
  0x5c   :  { %934 = vmatpush3.bf16.msra.mxu1 %v1010_v61  ;;  %913 = vmatprep.subr.bf16.mxu0 %v1011_v62 }
  0x5d   :  { %935 = vmatprep.subr.bf16.mxu1 %v1012_v63 }
  0x5f   :  { %914 = vmatpush3.bf16.msra.mxu0 %v1013_v0 }
  0x60   :  { %936 = vmatpush3.bf16.msra.mxu1 %v1014_v1  ;;  %915 = vmatprep.subr.bf16.mxu0 %v1015_v2 }
  0x61   :  { %937 = vmatprep.subr.bf16.mxu1 %v1016_v3 }
  0x63   :  { %916 = vmatpush3.bf16.msra.mxu0 %v1017_v4 }
  0x64   :  { %938 = vmatpush3.bf16.msra.mxu1 %v1018_v5 }
  0x66   :  { %717 = vmatmul.mubr.bf16.vlgmr.msra.gmra.mxu0 %v789_v7 }
  0x67   :  { %757 = vmatmul.mubr.bf16.vlgmr.msra.gmra.mxu1 %v791_v10 }
 0x106   :  { %v873_v13 = vpop.f32.mrf.mxu0 }
 0x107   :  { %v895_v14 = vpop.f32.mrf.mxu1 }
 0x108   :  { %v874_v15 = vpop.f32.mrf.mxu0 }
 0x109   :  { %v896_v16 = vpop.f32.mrf.mxu1  ;;  %v875_v21 = vadd.f32 %v874_v15, %v873_v13 }
 0x10a   :  { %v876_v17 = vpop.f32.mrf.mxu0  ;;  %v897_v22 = vadd.f32 %v896_v16, %v895_v14 }
 0x10b   :  { %v898_v18 = vpop.f32.mrf.mxu1 }
 0x10c   :  { %v877_v19 = vpop.f32.mrf.mxu0  ;;  %v679_v27 = vadd.f32 %v897_v22, %v875_v21 }
 0x10d   :  { %v899_v20 = vpop.f32.mrf.mxu1 }
 0x126   :  { %v917_v23 = vpop.f32.mrf.mxu0 }
 0x127   :  { %v939_v24 = vpop.f32.mrf.mxu1 }
 0x128   :  { %v918_v25 = vpop.f32.mrf.mxu0 }
 0x129   :  { %v940_v26 = vpop.f32.mrf.mxu1  ;;  %v919_v28 = vadd.f32 %v918_v25, %v917_v23 }
 0x12a   :  { %v920_v29 = vpop.f32.mrf.mxu0  ;;  %v941_v32 = vadd.f32 %v940_v26, %v939_v24 }
 0x12b   :  { %v942_v30 = vpop.f32.mrf.mxu1  ;;  %v719_v31 = vadd.f32 %v919_v28, %v679_v27 }
 0x12c   :  { %v921_v33 = vpop.f32.mrf.mxu0 }
 0x12d   :  { %v943_v34 = vpop.f32.mrf.mxu1  ;;  %v759_v36 = vadd.f32 %v941_v32, %v719_v31 }
 0x12f   :  { %v769_v37 = vmul.f32 %v766_v35, %v759_v36 }
 0x131   :  { %770 = vadd.xlane.f32.xlu0 %v769_v37 }
 0x1ba   :  { %v771_v39 = vpop.xlane.xlu0 %770 }
 0x1bb   :  { %v772_v40 = vadd.f32 %v771_v39, %v768_v38 }
 0x1bd   :  { %774 = vst.msk [vmem:[#allocation2] sm:$0xff] %vm58_vm0, %v772_v40 }
 0x1c4   :  { %v777_v41 = vld [vmem:[#allocation2] sm:$0xff] }
 0x1c5   :  { %778 = vst.msk [vmem:[%s1131_s3] sm:$0xff] %vm58_vm0, %v777_v41 }
 0x1c6   :  { %783 = vsyncpa [#allocation4], 1 }
 0x1c7   :  { %784 = vsyncpa [#allocation6], 1 }

</bundles_post_ra>
